<compile_context>
chip_gen: v5e
topology: v5e:2x2
jax: 0.10.0
libtpu: 0.0.40
codegen_flags: <defaults>
</compile_context>

<pallas_src>
import functools
import math

import jax
import jax.numpy as jnp
from jax.experimental import pallas as pl
from jax.experimental.pallas import tpu as pltpu

_LOG_2PI = math.log(2.0 * math.pi)


def _criterion_kernel(mu_ref, sigma_ref, y_ref, out_ref, *, bs, const, scale):
    # Refs hold the full (bs, nt) arrays in VMEM; statically slice the last
    # batch row (the only one that affects the result) as a (1, nt) view.
    row = pl.ds(bs - 1, 1)
    mu = mu_ref[row, :].astype(jnp.float32)
    sigma = sigma_ref[row, :].astype(jnp.float32)
    y = y_ref[row, :].astype(jnp.float32)

    diff = y - mu
    # Fused single reduction: sum((y-mu)^2 / sigma + log(sigma)).
    # Exact division kept (nt is tiny here; the log runs on the EUP slot
    # anyway). For very large nt use pl.reciprocal(sigma) instead.
    total = jnp.sum(diff * diff / sigma + jnp.log(sigma))

    # loss = 0.5 * (total + nt*log(2*pi)) / (nt * bs)
    # const and scale were folded in f64 at trace time.
    out_ref[0, 0] = (total + jnp.float32(const)) * jnp.float32(scale)


def criterion(mu, sigma, target_y):
    """mu, sigma, target_y: (bs, n_target). Returns scalar f32 loss."""
    assert mu.shape == sigma.shape == target_y.shape
    bs, nt = mu.shape

    const = float(nt) * _LOG_2PI          # nt * log(2*pi), folded in f64
    scale = 0.5 / (float(nt) * float(bs))  # 0.5 / (nt * bs), folded in f64

    # Full-array blocks (satisfy the (8,128)/full-dim rule for any bs, any
    # input dtype) -> three clean unmasked DMAs.
    full_spec = pl.BlockSpec((bs, nt), lambda i: (0, 0))

    itemsize = jnp.dtype(mu.dtype).itemsize
    cost = pl.CostEstimate(
        flops=5 * nt,
        transcendentals=nt,
        bytes_accessed=3 * bs * nt * itemsize + 4,
    )

    out = pl.pallas_call(
        functools.partial(_criterion_kernel, bs=bs, const=const, scale=scale),
        out_shape=jax.ShapeDtypeStruct((1, 1), jnp.float32),
        grid=(1,),
        in_specs=[full_spec, full_spec, full_spec],
        out_specs=pl.BlockSpec((1, 1), lambda i: (0, 0),
                               memory_space=pltpu.MemorySpace.SMEM),
        cost_estimate=cost,
    )(mu, sigma, target_y)
    return out[0, 0]


def criterion_ref(mu, sigma, target_y):
    """Pure-JAX reference matching the PyTorch (intentionally buggy) semantics."""
    bs, nt = mu.shape
    m = mu[bs - 1].astype(jnp.float32)
    s = sigma[bs - 1].astype(jnp.float32)
    y = target_y[bs - 1].astype(jnp.float32)
    diff = y - m
    log_prob = -0.5 * (jnp.sum(diff * diff / s)
                       + jnp.sum(jnp.log(s))
                       + nt * _LOG_2PI)
    return (-log_prob / nt) / bs


if __name__ == "__main__":
    key = jax.random.PRNGKey(0)
    k_mu, k_sig, k_y = jax.random.split(key, 3)

    bs, n_target = 2, 16
    mu = jax.random.normal(k_mu, (bs, n_target), dtype=jnp.float32)
    # variances must be positive
    sigma = jax.random.uniform(k_sig, (bs, n_target), dtype=jnp.float32,
                               minval=0.5, maxval=1.5)
    target_y = jax.random.normal(k_y, (bs, n_target), dtype=jnp.float32)

    loss = jax.block_until_ready(criterion(mu, sigma, target_y))
    loss_ref = jax.block_until_ready(criterion_ref(mu, sigma, target_y))

    assert jnp.allclose(loss, loss_ref, rtol=1e-5, atol=1e-5), (loss, loss_ref)
    print("KERNEL_OK")
</pallas_src>

<mosaic_0001>
module attributes {stable_mosaic.version = 11 : i64} {
  func.func @_criterion_kernel(%arg0: i32, %arg1: memref<2x16xf32, #tpu.memory_space<vmem>>, %arg2: memref<2x16xf32, #tpu.memory_space<vmem>>, %arg3: memref<2x16xf32, #tpu.memory_space<vmem>>, %arg4: memref<1x1xf32, #tpu.memory_space<smem>>) attributes {dimension_semantics = [#tpu.dimension_semantics<arbitrary>], iteration_bounds = array<i64: 1>, scalar_prefetch = 0 : i64, scratch_operands = 0 : i64, tpu.core_type = #tpu.core_type<tc>, window_params = [{pipeline_mode = #tpu.pipeline_mode<synchronous>, transform_indices = @transform_0, window_bounds = array<i64: 2, 16>}, {pipeline_mode = #tpu.pipeline_mode<synchronous>, transform_indices = @transform_1, window_bounds = array<i64: 2, 16>}, {pipeline_mode = #tpu.pipeline_mode<synchronous>, transform_indices = @transform_2, window_bounds = array<i64: 2, 16>}, {transform_indices = @transform_3, window_bounds = array<i64: 1, 1>}]} {
    %c1 = arith.constant 1 : index
    %c0 = arith.constant 0 : index
    %0 = vector.load %arg1[%c1, %c0] : memref<2x16xf32, #tpu.memory_space<vmem>>, vector<1x16xf32>
    %c1_0 = arith.constant 1 : index
    %c0_1 = arith.constant 0 : index
    %1 = vector.load %arg2[%c1_0, %c0_1] : memref<2x16xf32, #tpu.memory_space<vmem>>, vector<1x16xf32>
    %c1_2 = arith.constant 1 : index
    %c0_3 = arith.constant 0 : index
    %2 = vector.load %arg3[%c1_2, %c0_3] : memref<2x16xf32, #tpu.memory_space<vmem>>, vector<1x16xf32>
    %3 = arith.subf %2, %0 : vector<1x16xf32>
    %4 = arith.mulf %3, %3 : vector<1x16xf32>
    %5 = arith.divf %4, %1 : vector<1x16xf32>
    %6 = math.log %1 : vector<1x16xf32>
    %7 = arith.addf %5, %6 : vector<1x16xf32>
    %8 = vector.shape_cast %7 : vector<1x16xf32> to vector<1x1x16xf32>
    %cst = arith.constant dense<0.000000e+00> : vector<1xf32>
    %9 = vector.multi_reduction <add>, %8, %cst [1, 2] : vector<1x1x16xf32> to vector<1xf32>
    %10 = vector.shape_cast %9 : vector<1xf32> to vector<1x1x1xf32>
    %11 = vector.extract %10[0, 0, 0] : f32 from vector<1x1x1xf32>
    %cst_4 = arith.constant 29.4060326 : f32
    %12 = arith.addf %11, %cst_4 : f32
    %cst_5 = arith.constant 1.562500e-02 : f32
    %13 = arith.mulf %12, %cst_5 : f32
    %c0_6 = arith.constant 0 : index
    %c0_7 = arith.constant 0 : index
    %14 = memref.load %arg4[%c0_6, %c0_7] : memref<1x1xf32, #tpu.memory_space<smem>>
    memref.store %13, %arg4[%c0_6, %c0_7] : memref<1x1xf32, #tpu.memory_space<smem>>
    return
  }
  func.func @transform_0(%arg0: i32) -> (i32, i32) {
    %c0_i32 = arith.constant 0 : i32
    %c0_i32_0 = arith.constant 0 : i32
    %c0_i32_1 = arith.constant 0 : i32
    return %c0_i32, %c0_i32_0 : i32, i32
  }
  func.func @transform_1(%arg0: i32) -> (i32, i32) {
    %c0_i32 = arith.constant 0 : i32
    %c0_i32_0 = arith.constant 0 : i32
    %c0_i32_1 = arith.constant 0 : i32
    return %c0_i32, %c0_i32_0 : i32, i32
  }
  func.func @transform_2(%arg0: i32) -> (i32, i32) {
    %c0_i32 = arith.constant 0 : i32
    %c0_i32_0 = arith.constant 0 : i32
    %c0_i32_1 = arith.constant 0 : i32
    return %c0_i32, %c0_i32_0 : i32, i32
  }
  func.func @transform_3(%arg0: i32) -> (i32, i32) {
    %c0_i32 = arith.constant 0 : i32
    %c0_i32_0 = arith.constant 0 : i32
    %c0_i32_1 = arith.constant 0 : i32
    return %c0_i32, %c0_i32_0 : i32, i32
  }
}

</mosaic_0001>

<bundles_post_ra>
// kernel: tpu_custom_call.1
= control target key start
LH: loop header
LB: loop body
LE: loop exit
PB: predicated region body
PF: predicated region fallthrough
CT: control target
= control target key end

     0   :  { %8 = vsyncpa [#allocation3], 0  ;;  %s247_s0 = inlined_call_operand.hbm [shape: f32[2,16], index: 0, kind: input, shape index: {}]   ;;  %s248_s1 = inlined_call_operand.hbm [shape: f32[2,16], index: 1, kind: input, shape index: {}]   ;;  %s249_s2 = inlined_call_operand.hbm [shape: f32[2,16], index: 2, kind: input, shape index: {}]   ;;  %s250_s3 = inlined_call_operand.hbm [shape: f32[1,1], index: 3, kind: output, shape index: {}]  }
   0x1   :  { %9 = vsyncpa [#allocation6], 0  ;;  %s27_s14 = sshll.u32 %s248_s1, 4  ;;  %s28_s14 = int_to_ptr.hbm [resolvable:$true] %s27_s14 }
   0x2   :  { %10 = vsyncpa [#allocation4], 0  ;;  %s211_s15 = smov [#allocation5]   ;;  %s16_s19 = sshll.u32 %s247_s0, 4  ;;  %s17_s19 = int_to_ptr.hbm [resolvable:$true] %s16_s19 }
   0x3   :  { %s29_s16 = sshll.u32 %s211_s15, 4  ;;  %s212_s20 = smov [#allocation2]   ;;  %s30_s16 = int_to_ptr.vmem [resolvable:$true] %s29_s16 }
   0x4   :  { %32 = dma.hbm_to_vmem [thread:$0]  %s28_s14, 32, %s30_s16, [#allocation6]  }
   0x5   :  { %s18_s21 = sshll.u32 %s212_s20, 4  ;;  %s38_s24 = sshll.u32 %s249_s2, 4  ;;  %s19_s21 = int_to_ptr.vmem [resolvable:$true] %s18_s21  ;;  %s39_s24 = int_to_ptr.hbm [resolvable:$true] %s38_s24 }
   0x6   :  { %21 = dma.hbm_to_vmem [thread:$0]  %s17_s19, 32, %s19_s21, [#allocation3]  }
   0x7   :  { %s213_s1 = smov [#allocation7]  }
   0x8   :  { %s40_s25 = sshll.u32 %s213_s1, 4  ;;  %s41_s25 = int_to_ptr.vmem [resolvable:$true] %s40_s25 }
   0x9   :  { %43 = dma.hbm_to_vmem [thread:$0]  %s39_s24, 32, %s41_s25, [#allocation6]  }
   0xa   :  { %205 = dma.done.wait [#allocation3], 32  }
   0xb   :  { %206 = vsyncadd [#allocation3], 4294967264 }
   0xc   :  { %207 = dma.done.wait [#allocation6], 64  }
   0xd   :  { %208 = vsyncadd [#allocation6], 4294967232  ;;  %v57_v0 = vld [vmem:[#allocation5 + $0x1] sm:$0x1]  ;;  %v56_v1 = vld [vmem:[#allocation2 + $0x1] sm:$0x1] }
   0xe   :  { %117 = vrcp.f32 %v57_v0  ;;  %v58_v2 = vld [vmem:[#allocation7 + $0x1] sm:$0x1]  ;;  %v72_v6 = vand.u32 2147483648, %v57_v0  ;;  %vm66_vm0 = vweird.f32 %v57_v0  ;;  %v70_v8 = vand.u32 2147483647, %v57_v0  ;;  %s99_s26 = sshll.u32 %s250_s3, 4  ;;  %s100_s26 = int_to_ptr.hbm [resolvable:$true] %s99_s26 }
   0xf   :  { %119 = vlog2.f32 %v57_v0  ;;  %v59_v5 = vsub.f32 %v58_v2, %v56_v1  ;;  %vm79_vm4 = vcmask 122880   ;;  %s214_s30 = smov [#allocation8]  }
  0x10   :  { %v73_v11 = vor.u32 1.1754944e-38, %v72_v6  ;;  %vm71_vm3 = vcmp.eq.f32.partialorder %v70_v8, 8.507059e+37 }
  0x11   :  { %v60_v12 = vmul.f32 %v59_v5, %v59_v5 }
  0x14   :  { %v118_v3 = vpop.eup %117 }
  0x15   :  { %v62_v4 = vmul.f32 %v118_v3, %v57_v0  ;;  %vm67_vm1 = vweird.f32 %v118_v3  ;;  %v120_v10 = vpop.eup %119 }
  0x16   :  { %vm68_vm2 = vmor %vm66_vm0, %vm67_vm1  ;;  %v77_v15 = vmul.f32 0.6931472, %v120_v10 }
  0x17   :  { %v63_v7 = vsub.f32 1.0, %v62_v4 }
  0x19   :  { %v64_v9 = vmul.f32 %v118_v3, %v63_v7 }
  0x1b   :  { %v65_v13 = vadd.f32 %v118_v3, %v64_v9 }
  0x1d   :  { %v69_v14 = vsel %vm68_vm2, %v118_v3, %v65_v13 }
  0x1e   :  { %v74_v16 = vsel %vm71_vm3, %v73_v11, %v69_v14 }
  0x1f   :  { %v75_v17 = vmul.f32 %v74_v16, %v60_v12 }
  0x21   :  { %v78_v18 = vadd.f32 %v77_v15, %v75_v17 }
  0x23   :  { %v80_v19 = vsel %vm79_vm4, %v78_v18, 0.0 }
  0x24   :  { %81 = vadd.xlane.f32.xlu0 %v80_v19 }
  0x97   :  { %v82_v20 = vpop.xlane.xlu0 %81 }
  0x98   :  { %v83_v21 = vrot.slane %v82_v20, 4 }
  0x9a   :  { %v84_v22 = vadd.f32 %v83_v21, %v82_v20 }
  0x9c   :  { %v85_v23 = vrot.slane %v84_v22, 2 }
  0x9e   :  { %v86_v24 = vadd.f32 %v85_v23, %v84_v22 }
  0xa0   :  { %v87_v25 = vrot.slane %v86_v24, 1 }
  0xa2   :  { %v88_v26 = vadd.f32 %v87_v25, %v86_v24 }
  0xa4   :  { %111 = vpush %v88_v26 }
  0xd5   :  { %s112_s27 = spop %111 }
  0xd6   :  { %s90_s28 = sadd.f32 29.406033, %s112_s27 }
  0xd8   :  { %s91_s29 = smul.f32 0.015625, %s90_s28 }
  0xda   :  { %93 = sst [smem:[#allocation8]] %s91_s29 }
  0xdb   :  { %102 = dma.smem_to_hbm %s214_s30, 16, %s100_s26, [#allocation4]  }
  0xdc   :  { %209 = dma.done.wait [#allocation4], 16  }
  0xdd   :  { %210 = vsyncadd [#allocation4], 4294967280 }
  0xde   :  { %107 = sfence }
  0xdf   :  { %108 = vsyncpa [#allocation3], 1 }
  0xe0   :  { %109 = vsyncpa [#allocation6], 1 }
  0xe1   :  { %110 = vsyncpa [#allocation4], 1 }

</bundles_post_ra>
